<compile_context>
chip_gen: v7x
topology: tpu7x:2x2x1
jax: 0.10.0
libtpu: 0.0.40
codegen_flags: <defaults>
</compile_context>

<pallas_src>
import functools

import jax
import jax.numpy as jnp
import numpy as np
from jax import lax
from jax.experimental import pallas as pl
from jax.experimental.pallas import tpu as pltpu


# ---------------------------------------------------------------------------
# Pallas kernel: fused conv (single matmul) + BN scale/shift + ReLU epilogue
# ---------------------------------------------------------------------------
def _conv_bn_relu_kernel(x_ref, w_ref, scale_ref, shift_ref, o_ref, *,
                         KH, KW, TH, Wo, apply_relu):
    # x_ref:     (1, Hin, Win, Cin)      bf16 zero-padded NHWC image (whole image)
    # w_ref:     (KH*KW*Cin, Cout_pad)   bf16 HWIO-flattened conv weights (unscaled)
    # scale_ref: (1, Cout_pad)           f32 BN scale  = gamma / sqrt(var + eps)
    # shift_ref: (1, Cout_pad)           f32 BN shift  = beta - mean * scale
    # o_ref:     (1, TH*Wo, Cout_pad)    f32 output rows [r*TH, (r+1)*TH) of this image
    cin = x_ref.shape[-1]
    row0 = pl.program_id(1) * TH  # first output row of this tile (stride-1 kernel)

    # Gather the KH*KW shifted stride-1 windows and fuse them along the
    # contraction axis -> one (TH*Wo, KH*KW*Cin) patch matrix in VMEM.
    wins = []
    for kh in range(KH):
        for kw in range(KW):
            wins.append(x_ref[0, pl.ds(row0 + kh, TH), pl.ds(kw, Wo), :])  # (TH, Wo, Cin)
    patches = jnp.concatenate(wins, axis=-1)            # (TH, Wo, KH*KW*Cin)
    lhs = patches.reshape(TH * Wo, KH * KW * cin)        # collapse leading dims only

    # Single MXU pass; no vreg accumulator carried across matmuls.
    y = jnp.dot(lhs, w_ref[...], preferred_element_type=jnp.float32)
    y = y * scale_ref[...] + shift_ref[...]              # f32 BN epilogue
    if apply_relu:
        y = jnp.maximum(y, 0.0)
    o_ref[0] = y.astype(o_ref.dtype)


# ---------------------------------------------------------------------------
# Wrapper helpers
# ---------------------------------------------------------------------------
def _space_to_depth(x_pad, w_hwio, s):
    """Repack a stride-s conv as a stride-1 conv (input (H,W,C)->(H/s,W/s,s*s*C),
    weights regrouped + zero-padded), so the kernel never does strided reads."""
    n, hp, wp, cin = x_pad.shape
    kh, kw, _, cout = w_hwio.shape
    khr, kwr = -(-kh // s), -(-kw // s)
    hp2, wp2 = -(-hp // s) * s, -(-wp // s) * s

    x2 = jnp.pad(x_pad, ((0, 0), (0, hp2 - hp), (0, wp2 - wp), (0, 0)))
    x2 = x2.reshape(n, hp2 // s, s, wp2 // s, s, cin)
    x2 = x2.transpose(0, 1, 3, 2, 4, 5).reshape(n, hp2 // s, wp2 // s, s * s * cin)

    w2 = jnp.pad(w_hwio, ((0, khr * s - kh), (0, kwr * s - kw), (0, 0), (0, 0)))
    w2 = w2.reshape(khr, s, kwr, s, cin, cout)
    w2 = w2.transpose(0, 2, 1, 3, 4, 5).reshape(khr, kwr, s * s * cin, cout)
    return x2, w2


def _pick_row_tile(ho, wo, target_m):
    """Largest divisor th of ho with th*wo <= target_m and th*wo % 8 == 0
    (clean sublane layout); falls back to the full extent (always legal)."""
    start = min(ho, max(1, target_m // max(wo, 1)))
    for th in range(start, 0, -1):
        if ho % th == 0 and (th * wo) % 8 == 0 and th * wo <= target_m:
            return th
    return ho


# ---------------------------------------------------------------------------
# Wrapper: layout prep, pallas_call, crop/reshape back to NCHW
# ---------------------------------------------------------------------------
def basic_conv2d(x, conv_w, gamma, beta, run_mean, run_var, *,
                 stride=1, padding=0, eps=1e-5, output_relu=True,
                 m_tile_target=4096):
    """x: (N, Cin, H, W) f32; conv_w: (Cout, Cin, KH, KW) f32 (PyTorch layout)."""
    N, Cin, H, W = x.shape
    Cout, _, KH, KW = conv_w.shape
    s = stride

    Ho = (H + 2 * padding - KH) // s + 1
    Wo = (W + 2 * padding - KW) // s + 1

    # NCHW -> NHWC, zero-pad, single cast to bf16 (half the activation DMA).
    # (For an NHWC end-to-end network these two transposes and the pad can be
    # dropped / folded into the kernel — kept here to match the NCHW module API.)
    x_pad = jnp.pad(jnp.transpose(x, (0, 2, 3, 1)).astype(jnp.bfloat16),
                    ((0, 0), (padding, padding), (padding, padding), (0, 0)))
    w_hwio = jnp.transpose(conv_w, (2, 3, 1, 0))          # (KH, KW, Cin, Cout) f32

    if s > 1:
        # Space-to-depth: kernel always runs stride-1 contiguous slices.
        x_pad, w_hwio = _space_to_depth(x_pad, w_hwio, s)

    _, Hin, Win, Cin_k = x_pad.shape
    KH_k, KW_k, _, _ = w_hwio.shape
    Ho_k = Hin - KH_k + 1
    Wo_k = Win - KW_k + 1
    Kdim = KH_k * KW_k * Cin_k

    LANE = 128
    Cout_pad = ((Cout + LANE - 1) // LANE) * LANE

    # bf16 weights (unscaled), lane-padded to Cout_pad.
    w_flat = jnp.pad(w_hwio.reshape(Kdim, Cout).astype(jnp.bfloat16),
                     ((0, 0), (0, Cout_pad - Cout)))

    # BN (eval / running-stats) folded into an f32 scale+shift epilogue.
    scale = (gamma / jnp.sqrt(run_var + eps)).astype(jnp.float32)
    shift = (beta - run_mean * scale).astype(jnp.float32)
    scale_p = jnp.pad(scale, (0, Cout_pad - Cout)).reshape(1, Cout_pad)
    shift_p = jnp.pad(shift, (0, Cout_pad - Cout)).reshape(1, Cout_pad)

    TH = _pick_row_tile(Ho_k, Wo_k, m_tile_target)
    n_rows = Ho_k // TH
    M = Ho_k * Wo_k

    kernel = functools.partial(_conv_bn_relu_kernel,
                               KH=KH_k, KW=KW_k, TH=TH, Wo=Wo_k,
                               apply_relu=output_relu)

    out_flat = pl.pallas_call(
        kernel,
        out_shape=jax.ShapeDtypeStruct((N, M, Cout_pad), jnp.float32),
        grid_spec=pltpu.PrefetchScalarGridSpec(
            num_scalar_prefetch=0,
            grid=(N, n_rows),
            in_specs=[
                # Whole padded image per batch step (index map ignores r -> fetched once).
                pl.BlockSpec((1, Hin, Win, Cin_k), lambda n, r: (n, 0, 0, 0)),
                pl.BlockSpec((Kdim, Cout_pad), lambda n, r: (0, 0)),
                pl.BlockSpec((1, Cout_pad), lambda n, r: (0, 0)),
                pl.BlockSpec((1, Cout_pad), lambda n, r: (0, 0)),
            ],
            out_specs=pl.BlockSpec((1, TH * Wo_k, Cout_pad), lambda n, r: (n, r, 0)),
        ),
        compiler_params=pltpu.CompilerParams(
            dimension_semantics=("parallel", "parallel")),
    )(x_pad, w_flat, scale_p, shift_p)

    # Crop pad lanes / extra stride-repack rows, back to NCHW to match PyTorch.
    out = out_flat.reshape(N, Ho_k, Wo_k, Cout_pad)[:, :Ho, :Wo, :Cout]
    return jnp.transpose(out, (0, 3, 1, 2))


# ---------------------------------------------------------------------------
# Pure-JAX reference for the correctness check
# ---------------------------------------------------------------------------
def basic_conv2d_ref(x, conv_w, gamma, beta, run_mean, run_var,
                     *, stride=1, padding=0, eps=1e-5, output_relu=True):
    y = lax.conv_general_dilated(
        x, conv_w, window_strides=(stride, stride),
        padding=[(padding, padding), (padding, padding)],
        dimension_numbers=("NCHW", "OIHW", "NCHW"))
    scale = (gamma / jnp.sqrt(run_var + eps)).reshape(1, -1, 1, 1)
    shift = (beta - run_mean * gamma / jnp.sqrt(run_var + eps)).reshape(1, -1, 1, 1)
    y = y * scale + shift
    if output_relu:
        y = jnp.maximum(y, 0.0)
    return y


if __name__ == "__main__":
    # BasicConv2d(in_planes=4, out_planes=8, kernel_size=3, ...)
    N, Cin, H, W = 2, 4, 16, 16
    Cout, KH, KW = 8, 3, 3

    key = jax.random.PRNGKey(0)
    k1, k2, k3, k4, k5, k6 = jax.random.split(key, 6)
    x = jax.random.normal(k1, (N, Cin, H, W), dtype=jnp.float32)
    conv_w = jax.random.normal(k2, (Cout, Cin, KH, KW), dtype=jnp.float32) * 0.1
    gamma = jax.random.uniform(k3, (Cout,), minval=0.5, maxval=1.5, dtype=jnp.float32)
    beta = jax.random.normal(k4, (Cout,), dtype=jnp.float32) * 0.1
    run_mean = jax.random.normal(k5, (Cout,), dtype=jnp.float32) * 0.1
    run_var = jax.random.uniform(k6, (Cout,), minval=0.5, maxval=1.5, dtype=jnp.float32)

    # Case 1: stride=1, padding=1, ReLU.  Small m_tile_target exercises the
    # multi-row-tile grid (second parallel axis).
    out1 = jax.block_until_ready(
        basic_conv2d(x, conv_w, gamma, beta, run_mean, run_var,
                     stride=1, padding=1, output_relu=True, m_tile_target=128))
    ref1 = basic_conv2d_ref(x, conv_w, gamma, beta, run_mean, run_var,
                            stride=1, padding=1, output_relu=True)
    np.testing.assert_allclose(np.asarray(out1), np.asarray(ref1), rtol=3e-2, atol=3e-2)

    # Case 2: stride=2, padding=1, no ReLU.  Exercises the space-to-depth
    # stride path (the kernel itself is always stride-1).
    out2 = jax.block_until_ready(
        basic_conv2d(x, conv_w, gamma, beta, run_mean, run_var,
                     stride=2, padding=1, output_relu=False))
    ref2 = basic_conv2d_ref(x, conv_w, gamma, beta, run_mean, run_var,
                            stride=2, padding=1, output_relu=False)
    np.testing.assert_allclose(np.asarray(out2), np.asarray(ref2), rtol=3e-2, atol=3e-2)

    print("KERNEL_OK")
</pallas_src>

<mosaic_0001>
module attributes {stable_mosaic.version = 11 : i64} {
  func.func @_conv_bn_relu_kernel(%arg0: i32, %arg1: i32, %arg2: memref<1x18x18x4xbf16, #tpu.memory_space<vmem>>, %arg3: memref<36x128xbf16, #tpu.memory_space<vmem>>, %arg4: memref<1x128xf32, #tpu.memory_space<vmem>>, %arg5: memref<1x128xf32, #tpu.memory_space<vmem>>, %arg6: memref<1x128x128xf32, #tpu.memory_space<vmem>>) attributes {dimension_semantics = [#tpu.dimension_semantics<parallel>, #tpu.dimension_semantics<parallel>], iteration_bounds = array<i64: 2, 2>, scalar_prefetch = 0 : i64, scratch_operands = 0 : i64, tpu.core_type = #tpu.core_type<tc>, window_params = [{transform_indices = @transform_0, window_bounds = array<i64: 1, 18, 18, 4>}, {pipeline_mode = #tpu.pipeline_mode<synchronous>, transform_indices = @transform_1, window_bounds = array<i64: 36, 128>}, {pipeline_mode = #tpu.pipeline_mode<synchronous>, transform_indices = @transform_2, window_bounds = array<i64: 1, 128>}, {pipeline_mode = #tpu.pipeline_mode<synchronous>, transform_indices = @transform_3, window_bounds = array<i64: 1, 128>}, {transform_indices = @transform_4, window_bounds = array<i64: 1, 128, 128>}]} {
    %c8_i32 = arith.constant 8 : i32
    %0 = arith.muli %arg1, %c8_i32 : i32
    %c0_i32 = arith.constant 0 : i32
    %1 = arith.addi %0, %c0_i32 : i32
    %c0 = arith.constant 0 : index
    %2 = arith.index_cast %1 : i32 to index
    %c0_0 = arith.constant 0 : index
    %c0_1 = arith.constant 0 : index
    %3 = vector.load %arg2[%c0, %2, %c0_0, %c0_1] : memref<1x18x18x4xbf16, #tpu.memory_space<vmem>>, vector<1x8x16x4xbf16>
    %4 = vector.shape_cast %3 : vector<1x8x16x4xbf16> to vector<8x16x4xbf16>
    %c0_i32_2 = arith.constant 0 : i32
    %5 = arith.addi %0, %c0_i32_2 : i32
    %c0_3 = arith.constant 0 : index
    %6 = arith.index_cast %5 : i32 to index
    %c1 = arith.constant 1 : index
    %c0_4 = arith.constant 0 : index
    %7 = vector.load %arg2[%c0_3, %6, %c1, %c0_4] : memref<1x18x18x4xbf16, #tpu.memory_space<vmem>>, vector<1x8x16x4xbf16>
    %8 = vector.shape_cast %7 : vector<1x8x16x4xbf16> to vector<8x16x4xbf16>
    %c0_i32_5 = arith.constant 0 : i32
    %9 = arith.addi %0, %c0_i32_5 : i32
    %c0_6 = arith.constant 0 : index
    %10 = arith.index_cast %9 : i32 to index
    %c2 = arith.constant 2 : index
    %c0_7 = arith.constant 0 : index
    %11 = vector.load %arg2[%c0_6, %10, %c2, %c0_7] : memref<1x18x18x4xbf16, #tpu.memory_space<vmem>>, vector<1x8x16x4xbf16>
    %12 = vector.shape_cast %11 : vector<1x8x16x4xbf16> to vector<8x16x4xbf16>
    %c1_i32 = arith.constant 1 : i32
    %13 = arith.addi %0, %c1_i32 : i32
    %c0_8 = arith.constant 0 : index
    %14 = arith.index_cast %13 : i32 to index
    %c0_9 = arith.constant 0 : index
    %c0_10 = arith.constant 0 : index
    %15 = vector.load %arg2[%c0_8, %14, %c0_9, %c0_10] : memref<1x18x18x4xbf16, #tpu.memory_space<vmem>>, vector<1x8x16x4xbf16>
    %16 = vector.shape_cast %15 : vector<1x8x16x4xbf16> to vector<8x16x4xbf16>
    %c1_i32_11 = arith.constant 1 : i32
    %17 = arith.addi %0, %c1_i32_11 : i32
    %c0_12 = arith.constant 0 : index
    %18 = arith.index_cast %17 : i32 to index
    %c1_13 = arith.constant 1 : index
    %c0_14 = arith.constant 0 : index
    %19 = vector.load %arg2[%c0_12, %18, %c1_13, %c0_14] : memref<1x18x18x4xbf16, #tpu.memory_space<vmem>>, vector<1x8x16x4xbf16>
    %20 = vector.shape_cast %19 : vector<1x8x16x4xbf16> to vector<8x16x4xbf16>
    %c1_i32_15 = arith.constant 1 : i32
    %21 = arith.addi %0, %c1_i32_15 : i32
    %c0_16 = arith.constant 0 : index
    %22 = arith.index_cast %21 : i32 to index
    %c2_17 = arith.constant 2 : index
    %c0_18 = arith.constant 0 : index
    %23 = vector.load %arg2[%c0_16, %22, %c2_17, %c0_18] : memref<1x18x18x4xbf16, #tpu.memory_space<vmem>>, vector<1x8x16x4xbf16>
    %24 = vector.shape_cast %23 : vector<1x8x16x4xbf16> to vector<8x16x4xbf16>
    %c2_i32 = arith.constant 2 : i32
    %25 = arith.addi %0, %c2_i32 : i32
    %c0_19 = arith.constant 0 : index
    %26 = arith.index_cast %25 : i32 to index
    %c0_20 = arith.constant 0 : index
    %c0_21 = arith.constant 0 : index
    %27 = vector.load %arg2[%c0_19, %26, %c0_20, %c0_21] : memref<1x18x18x4xbf16, #tpu.memory_space<vmem>>, vector<1x8x16x4xbf16>
    %28 = vector.shape_cast %27 : vector<1x8x16x4xbf16> to vector<8x16x4xbf16>
    %c2_i32_22 = arith.constant 2 : i32
    %29 = arith.addi %0, %c2_i32_22 : i32
    %c0_23 = arith.constant 0 : index
    %30 = arith.index_cast %29 : i32 to index
    %c1_24 = arith.constant 1 : index
    %c0_25 = arith.constant 0 : index
    %31 = vector.load %arg2[%c0_23, %30, %c1_24, %c0_25] : memref<1x18x18x4xbf16, #tpu.memory_space<vmem>>, vector<1x8x16x4xbf16>
    %32 = vector.shape_cast %31 : vector<1x8x16x4xbf16> to vector<8x16x4xbf16>
    %c2_i32_26 = arith.constant 2 : i32
    %33 = arith.addi %0, %c2_i32_26 : i32
    %c0_27 = arith.constant 0 : index
    %34 = arith.index_cast %33 : i32 to index
    %c2_28 = arith.constant 2 : index
    %c0_29 = arith.constant 0 : index
    %35 = vector.load %arg2[%c0_27, %34, %c2_28, %c0_29] : memref<1x18x18x4xbf16, #tpu.memory_space<vmem>>, vector<1x8x16x4xbf16>
    %36 = vector.shape_cast %35 : vector<1x8x16x4xbf16> to vector<8x16x4xbf16>
    %37 = tpu.concatenate %4, %8, %12, %16, %20, %24, %28, %32, %36 in 2 : vector<8x16x4xbf16>, vector<8x16x4xbf16>, vector<8x16x4xbf16>, vector<8x16x4xbf16>, vector<8x16x4xbf16>, vector<8x16x4xbf16>, vector<8x16x4xbf16>, vector<8x16x4xbf16>, vector<8x16x4xbf16> -> vector<8x16x36xbf16>
    %38 = vector.shape_cast %37 : vector<8x16x36xbf16> to vector<128x36xbf16>
    %c0_30 = arith.constant 0 : index
    %c0_31 = arith.constant 0 : index
    %39 = vector.load %arg3[%c0_30, %c0_31] : memref<36x128xbf16, #tpu.memory_space<vmem>>, vector<36x128xbf16>
    %cst = arith.constant dense<0.000000e+00> : vector<128x128xf32>
    %40 = tpu.matmul %38, %39, %cst {dimension_numbers = #tpu.dot_dimension_numbers<[1], [0], [0], [1], [0, 0, 1, 1], [], []>} : vector<128x36xbf16>, vector<36x128xbf16>, vector<128x128xf32> -> vector<128x128xf32>
    %c0_32 = arith.constant 0 : index
    %c0_33 = arith.constant 0 : index
    %41 = vector.load %arg4[%c0_32, %c0_33] : memref<1x128xf32, #tpu.memory_space<vmem>>, vector<1x128xf32>
    %42 = vector.broadcast %41 : vector<1x128xf32> to vector<128x128xf32>
    %43 = arith.mulf %40, %42 : vector<128x128xf32>
    %c0_34 = arith.constant 0 : index
    %c0_35 = arith.constant 0 : index
    %44 = vector.load %arg5[%c0_34, %c0_35] : memref<1x128xf32, #tpu.memory_space<vmem>>, vector<1x128xf32>
    %45 = vector.broadcast %44 : vector<1x128xf32> to vector<128x128xf32>
    %46 = arith.addf %43, %45 : vector<128x128xf32>
    %cst_36 = arith.constant 0.000000e+00 : f32
    %47 = vector.broadcast %cst_36 : f32 to vector<128x128xf32>
    %48 = arith.maximumf %46, %47 : vector<128x128xf32>
    %c0_37 = arith.constant 0 : index
    %c0_38 = arith.constant 0 : index
    %c0_39 = arith.constant 0 : index
    %49 = vector.load %arg6[%c0_37, %c0_38, %c0_39] : memref<1x128x128xf32, #tpu.memory_space<vmem>>, vector<1x128x128xf32>
    %50 = vector.shape_cast %49 : vector<1x128x128xf32> to vector<128x128xf32>
    %51 = vector.shape_cast %48 : vector<128x128xf32> to vector<1x128x128xf32>
    tpu.vector_store %arg6[%c0_37, %c0_38, %c0_39], %51 {strides = array<i32>} : memref<1x128x128xf32, #tpu.memory_space<vmem>>, vector<1x128x128xf32>,
    return
  }
  func.func @transform_0(%arg0: i32, %arg1: i32) -> (i32, i32, i32, i32) {
    %c0_i32 = arith.constant 0 : i32
    %c0_i32_0 = arith.constant 0 : i32
    %c0_i32_1 = arith.constant 0 : i32
    %c0_i32_2 = arith.constant 0 : i32
    return %arg0, %c0_i32, %c0_i32_0, %c0_i32_1 : i32, i32, i32, i32
  }
  func.func @transform_1(%arg0: i32, %arg1: i32) -> (i32, i32) {
    %c0_i32 = arith.constant 0 : i32
    %c0_i32_0 = arith.constant 0 : i32
    %c0_i32_1 = arith.constant 0 : i32
    return %c0_i32, %c0_i32_0 : i32, i32
  }
  func.func @transform_2(%arg0: i32, %arg1: i32) -> (i32, i32) {
    %c0_i32 = arith.constant 0 : i32
    %c0_i32_0 = arith.constant 0 : i32
    %c0_i32_1 = arith.constant 0 : i32
    return %c0_i32, %c0_i32_0 : i32, i32
  }
  func.func @transform_3(%arg0: i32, %arg1: i32) -> (i32, i32) {
    %c0_i32 = arith.constant 0 : i32
    %c0_i32_0 = arith.constant 0 : i32
    %c0_i32_1 = arith.constant 0 : i32
    return %c0_i32, %c0_i32_0 : i32, i32
  }
  func.func @transform_4(%arg0: i32, %arg1: i32) -> (i32, i32, i32) {
    %c0_i32 = arith.constant 0 : i32
    %c0_i32_0 = arith.constant 0 : i32
    return %arg0, %arg1, %c0_i32 : i32, i32, i32
  }
}

</mosaic_0001>

<bundles_post_ra>
// kernel: tpu_custom_call.1
= control target key start
LH: loop header
LB: loop body
LE: loop exit
PB: predicated region body
PF: predicated region fallthrough
CT: control target
= control target key end

     0   :  { %9 = vsyncpa [#allocation3], 0  ;;  %s2730_s0 = inlined_call_operand.vmem [shape: bf16[2,18,18,4], index: 0, kind: input, shape index: {}]   ;;  %s2731_s1 = inlined_call_operand.vmem [shape: bf16[36,128], index: 1, kind: input, shape index: {}]   ;;  %s2732_s2 = inlined_call_operand.vmem [shape: f32[1,128], index: 2, kind: input, shape index: {}]   ;;  %s2733_s3 = inlined_call_operand.vmem [shape: f32[1,128], index: 3, kind: input, shape index: {}]   ;;  %s2734_s4 = inlined_call_operand.hbm [shape: f32[2,256,128], index: 4, kind: output, shape index: {}]  }
   0x1   :  { %11 = vsyncpa [#allocation3 + $0x1], 0  ;;  %s2026_s15 = smov 0   ;;  %s2028_s16 = smov 0  }
   0x2   :  { %s2030_s17 = smov 0   ;;  %s2032_s18 = smov 0  }
   0x3   :  { %s2034_s19 = smov 0   ;;  %s2036_s20 = smov 0  }
   0x4   :  { %s2038_s21 = smov 0   ;;  %s2040_s22 = smov 0  }
   0x5 LB: > { %s1528_s23 = sadd.s32 4294967295, %s1989_s22   ;;  %s1529_s24 = sadd.s32 4294967294, %s1989_s22   ;;  %s1989_s22 = sphi %s2040_s22, %s17_s22   ;;  %s1985_s21 = sphi %s2038_s21, %s2743_s21   ;;  %s1981_s20 = sphi %s2036_s20, %s2742_s20   ;;  %s1977_s19 = sphi %s2034_s19, %s2741_s19   ;;  %s1973_s18 = sphi %s2032_s18, %s2740_s18   ;;  %s1969_s17 = sphi %s2030_s17, %s2739_s17   ;;  %s1965_s16 = sphi %s2028_s16, %s2738_s16   ;;  %s1961_s15 = sphi %s2026_s15, %s2737_s15  }
   0x6   : > { %s26_s25 = sadd.s32 1, %s1981_s20  ;;  %s29_s26 = sadd.s32 1, %s1985_s21 }
   0x7   : > { %p27_p0 = scmp.ge.s32.totalorder %s26_s25, 2  ;;  %p137_p1 = scmp.ne.s32.totalorder %s1969_s17, %s1965_s16 }
   0x8   : > { %p138_p2 = scmp.eq.s32.totalorder %s1528_s23, 3  ;;  %p143_p5 = scmp.ne.s32.totalorder %s1965_s16, %s1961_s15 }
   0x9   : > { %s2745_s25 = smov (%p27_p0, %s26_s25), 0  ;;  %s2747_s26 = smov (!%p27_p0, %s29_s26), %s1985_s21 }
   0xa   : > { %s123_s27 = ssub.s32 %s1981_s20, %s2745_s25  ;;  %p2077_p3 = por %p138_p2, %p137_p1 }
   0xb   : > { %p31_p4 = scmp.ge.s32.totalorder %s2747_s26, 2  ;;  %p144_p6 = scmp.eq.s32.totalorder %s1529_s24, 3 }
   0xc   : > { %p1532_p7 = scmp.ge.s32.totalorder %s1989_s22, 1  ;;  %p179_p9 = scmp.lt.s32.totalorder %s1989_s22, 5 }
   0xd   : > { %s2749_s26 = smov (%p31_p4, %s2747_s26), 0  ;;  %p2086_p8 = por %p144_p6, %p143_p5 }
   0xe   : > { %s122_s30 = ssub.s32 %s1985_s21, %s2749_s26  ;;  %s127_s5 = sadd.s32 1, %s1969_s17 }
   0xf   : > { %s124_s6 = sor.u32 %s123_s27, %s122_s30  ;;  %p180_p10 = pnand %p1532_p7, %p179_p9 }
  0x10   : > { %p125_p11 = scmp.eq.s32.totalorder %s124_s6, 0  ;;  %p205_p12 = scmp.lt.s32.totalorder (!%p180_p10), %s1977_s19, 1  ;;  %vm521_vm0 = vcmask (!%p180_p10), 1046528   ;;  %vm384_vm1 = vsmask.f32 (!%p180_p10), 7424  ;;  %vm1247_vm2 = vcmask (!%p180_p10), 1041408  }
  0x11   : > { %183 = sbr.rel (%p180_p10) target bundleno = 512 (0x200), region = 36  ;;  %s1991_s23 = smov (!%p180_p10), 12   ;;  %vm1074_vm3 = vcmask (!%p180_p10), 31744   ;;  %vm1091_vm4 = vcmask (!%p180_p10), 64512   ;;  %vm1108_vm5 = vcmask (!%p180_p10), 97280   ;;  %vm1125_vm6 = vcmask (!%p180_p10), 130048  }
  0x12   : > { %s2095_s7 = scalar_select %p125_p11, %s1969_s17, %s127_s5  }
  0x13   : > { %s1697_s9 = smul.u32 (!%p180_p10), 96, %s1973_s18  ;;  %s1992_s24 = smov (!%p180_p10), 8   ;;  %vm1142_vm7 = vcmask (!%p180_p10), 162816   ;;  %vm1159_vm8 = vcmask (!%p180_p10), 195584   ;;  %vm1176_vm9 = vcmask (!%p180_p10), 228352   ;;  %vm1193_vm10 = vcmask (!%p180_p10), 261120  }
  0x14   : > { %s1993_s27 = smov (!%p180_p10), 4   ;;  %s1994_s30 = smov (!%p180_p10), 16   ;;  %vm1230_vm11 = vcmask (!%p180_p10), 293888  }
  0x15   : > { %s1995_s5 = smov (!%p180_p10), 20   ;;  %s1997_s12 = smov (!%p180_p10), 28  }
  0x16   : > { %s1692_s11 = sshll.u32 (!%p180_p10), %s1973_s18, 4 }
  0x18   : > { %s206_s8 = scalar_select %p205_p12, %s1977_s19, 1 }
  0x1a   : > { %s1739_s10 = smul.u32 216, %s206_s8  ;;  %s1999_s8 = smov [#allocation2]  }
  0x1c   : > { %s209_s13 = scalar_lea.vmem %s2730_s0, %s1739_s10 }
  0x1d   : > { %s2103_s14 = scalar_lea.vmem %s209_s13, %s1697_s9  ;;  %s1996_s9 = smov 24  }
  0x1e   : > { %v1548_v0 = vld [vmem:[%s2103_s14 + $0x3c] sm:$0xf]  ;;  %v2107_v1 = vld [vmem:[%s2103_s14 + $0x40] sm:$0xf]  ;;  %v1540_v3 = vld [vmem:[%s2103_s14 + $0xc] sm:$0xf] }
  0x1f   : > { %v2110_v2 = vcombine.low %v1548_v0, %v2107_v1  ;;  %v2114_v4 = vld [vmem:[%s2103_s14 + $0x10] sm:$0xf]  ;;  %v225_v6 = vld [vmem:[%s2103_s14 + $0x34] sm:$0xf]  ;;  %v217_v12 = vld [vmem:[%s2103_s14 + $0x4] sm:$0xf] }
  0x20   : > { %v2117_v5 = vcombine.low %v1540_v3, %v2114_v4  ;;  %v244_v7 = vld [vmem:[%s2103_s14 + $0x30] sm:$0xe]  ;;  %v2124_v8 = vld [vmem:[%s2103_s14 + $0x38] ss:$0 sps:$4 sm:$0x11]   ;;  %s1998_s13 = smov 32  }
  0x21   : > { %610 = vrot.lane.b32.xlu1 %v2110_v2, %s1991_s23  ;;  %v1626_v9 = vcombine.low %v244_v7, %v225_v6  ;;  %v224_v10 = vld [vmem:[%s2103_s14 + $0x30] sm:$0xf]  ;;  %v693_v11 = vshll.u32 %v2110_v2, 16  ;;  %v535_v14 = vrot.slane %v2124_v8, 1  ;;  %v240_v15 = vld [vmem:[%s2103_s14] sm:$0xe] }
  0x22   : > { %602 = vrot.lane.b32.xlu0 %v2117_v5, %s1991_s23  ;;  %v216_v16 = vld [vmem:[%s2103_s14] sm:$0xf]  ;;  %v645_v17 = vshll.u32 %v2117_v5, 16  ;;  %v2135_v18 = vcombine.low %v224_v10, %v225_v6  ;;  %v1827_v19 = vld [vmem:[%s2103_s14 + $0x8] ss:$0 sps:$4 sm:$0x11]   ;;  %v1622_v20 = vcombine.low %v240_v15, %v217_v12 }
  0x23   : > { %v534_v13 = vrot.slane %v1626_v9, 1  ;;  %v226_v21 = vld [vmem:[%s2103_s14 + $0x3c] sm:$0xf]  ;;  %v2140_v23 = vcombine.low %v216_v16, %v217_v12  ;;  %v227_v24 = vld [vmem:[%s2103_s14 + $0x40] sm:$0xf]  ;;  %v523_v27 = vrot.slane %v1827_v19, 1 }
  0x24   : > { %v245_v25 = vld [vmem:[%s2103_s14 + $0x3c] sm:$0xe]  ;;  %v522_v26 = vrot.slane %v1622_v20, 1  ;;  %v1831_v28 = vld [vmem:[%s2103_s14 + $0x44] ss:$0 sps:$4 sm:$0x11]   ;;  %v2147_v31 = vcombine.low %v226_v21, %v227_v24 }
  0x25   : > { %v536_v22 = vsel %vm521_vm0, %v534_v13, %v535_v14  ;;  %v1627_v29 = vcombine.low %v245_v25, %v227_v24  ;;  %v434_v30 = vshrl.u32 %v2135_v18, 16  ;;  %v218_v32 = vld [vmem:[%s2103_s14 + $0xc] sm:$0xf]  ;;  %v219_v33 = vld [vmem:[%s2103_s14 + $0x10] sm:$0xf]  ;;  %v538_v36 = vrot.slane %v1831_v28, 1 }
  0x26   : > { %554 = vrot.lane.b32.xlu1 %v536_v22, %s1992_s24  ;;  %v524_v34 = vsel %vm521_vm0, %v522_v26, %v523_v27  ;;  %v241_v37 = vld [vmem:[%s2103_s14 + $0xc] sm:$0xe]  ;;  %v2153_v38 = vcombine.low %v218_v32, %v219_v33  ;;  %v1834_v39 = vld [vmem:[%s2103_s14 + $0x14] ss:$0 sps:$4 sm:$0x11]   ;;  %v386_v41 = vshrl.u32 %v2140_v23, 16 }
  0x27   : > { %v537_v35 = vrot.slane %v1627_v29, 1  ;;  %546 = vrot.lane.b32.xlu0 %v524_v34, %s1992_s24  ;;  %v1623_v40 = vcombine.low %v241_v37, %v219_v33  ;;  %v388_v42 = vshll.u32 %v2140_v23, 16  ;;  %v393_v43 = vshll.u32 %v1827_v19, 16  ;;  %v1550_v52 = vld [vmem:[%s2103_s14 + $0x48] sm:$0xf] }
  0x28   : > { %v398_v45 = vshrl.u32 %v2153_v38, 16  ;;  %v400_v46 = vshll.u32 %v2153_v38, 16  ;;  %v446_v47 = vshrl.u32 %v2147_v31, 16  ;;  %v526_v49 = vrot.slane %v1834_v39, 1  ;;  %v2167_v57 = vld [vmem:[%s2103_s14 + $0x4c] sm:$0xf] }
  0x29   : > { %v539_v44 = vsel %vm521_vm0, %v537_v35, %v538_v36  ;;  %v525_v48 = vrot.slane %v1623_v40, 1  ;;  %v405_v50 = vshll.u32 %v1834_v39, 16  ;;  %v390_v51 = vrot.slane %v388_v42, 1  ;;  %v1542_v62 = vld [vmem:[%s2103_s14 + $0x18] sm:$0xf] }
  0x2a   : > { %556 = vrot.lane.b32.xlu1 %v539_v44, %s1992_s24  ;;  %v402_v53 = vrot.slane %v400_v46, 1  ;;  %v395_v54 = vrot.slane %v393_v43, 1  ;;  %v448_v55 = vshll.u32 %v2147_v31, 16  ;;  %v453_v56 = vshll.u32 %v1831_v28, 16  ;;  %v2173_v63 = vld [vmem:[%s2103_s14 + $0x1c] sm:$0xf] }
  0x2b   : > { %v527_v58 = vsel %vm521_vm0, %v525_v48, %v526_v49  ;;  %v407_v59 = vrot.slane %v405_v50, 1  ;;  %v391_v60 = vor.u32 %v390_v51, %v386_v41  ;;  %v436_v61 = vshll.u32 %v2135_v18, 16  ;;  %v2180_v13 = vld [vmem:[%s2103_s14 + $0x44] ss:$0 sps:$4 sm:$0x11]  }
  0x2c   : > { %548 = vrot.lane.b32.xlu0 %v527_v58, %s1992_s24  ;;  %v403_v0 = vor.u32 %v402_v53, %v398_v45  ;;  %v450_v3 = vrot.slane %v448_v55, 1  ;;  %v455_v6 = vrot.slane %v453_v56, 1  ;;  %v441_v7 = vshll.u32 %v2124_v8, 16  ;;  %v2185_v20 = vld [vmem:[%s2103_s14 + $0x14] ss:$0 sps:$4 sm:$0x11]  }
  0x2d   : > { %v396_v9 = vsel %vm384_vm1, %v391_v60, %v395_v54  ;;  %v438_v10 = vrot.slane %v436_v61, 1  ;;  %v1635_v12 = vcombine.low %v1550_v52, %v2167_v57  ;;  %v1631_v19 = vcombine.low %v1542_v62, %v2173_v63  ;;  %v2192_v24 = vld [vmem:[%s2103_s14 + $0x50] ss:$0 sps:$4 sm:$0x11]   ;;  %v1568_v40 = vld [vmem:[%s2103_s14 + $0x3c] sm:$0xe] }
  0x2e   : > { %v408_v14 = vsel %vm384_vm1, %v403_v0, %v407_v59  ;;  %v451_v15 = vor.u32 %v450_v3, %v446_v47  ;;  %v443_v16 = vrot.slane %v441_v7, 1  ;;  %v691_v21 = vshrl.u32 %v2110_v2, 16  ;;  %v1564_v43 = vld [vmem:[%s2103_s14 + $0xc] sm:$0xe]  ;;  %v1569_v49 = vld [vmem:[%s2103_s14 + $0x48] sm:$0xe] }
  0x2f   : > { %483 = vrot.lane.b32.xlu1 %v408_v14, %s1993_s27  ;;  %v439_v8 = vor.u32 %v438_v10, %v434_v30  ;;  %v695_v22 = vrot.slane %v693_v11, 1  ;;  %v705_v26 = vshll.u32 %v1635_v12, 16  ;;  %v698_v27 = vshll.u32 %v2180_v13, 16  ;;  %v2203_v11 = vld [vmem:[%s2103_s14 + $0x20] ss:$0 sps:$4 sm:$0x11]  }
  0x30   : > { %481 = vrot.lane.b32.xlu0 %v396_v9, %s1993_s27  ;;  %v456_v25 = vsel %vm384_vm1, %v451_v15, %v455_v6  ;;  %v643_v28 = vshrl.u32 %v2117_v5, 16  ;;  %v657_v30 = vshll.u32 %v1631_v19, 16  ;;  %v647_v32 = vrot.slane %v645_v17, 1  ;;  %v1565_v53 = vld [vmem:[%s2103_s14 + $0x18] sm:$0xe] }
  0x31   : > { %v444_v29 = vsel %vm384_vm1, %v439_v8, %v443_v16  ;;  %v650_v2 = vshll.u32 %v2185_v20, 16  ;;  %v696_v33 = vor.u32 %v695_v22, %v691_v21  ;;  %v700_v34 = vrot.slane %v698_v27, 1  ;;  %v1582_v54 = vld [vmem:[%s2103_s14 + $0x48] sm:$0xf]  ;;  %v1574_v55 = vld [vmem:[%s2103_s14 + $0x18] sm:$0xf] }
  0x32   : > { %v648_v35 = vor.u32 %v647_v32, %v643_v28  ;;  %v703_v36 = vshrl.u32 %v1635_v12, 16  ;;  %v707_v37 = vrot.slane %v705_v26, 1  ;;  %v710_v39 = vshll.u32 %v2192_v24, 16  ;;  %v2230_v60 = vld [vmem:[%s2103_s14 + $0x1c] sm:$0xf] }
  0x33   : > { %491 = vrot.lane.b32.xlu1 %v456_v25, %s1993_s27  ;;  %v652_v5 = vrot.slane %v650_v2, 1  ;;  %v655_v17 = vshrl.u32 %v1631_v19, 16  ;;  %v659_v41 = vrot.slane %v657_v30, 1  ;;  %v662_v42 = vshll.u32 %v2203_v11, 16  ;;  %v1584_v7 = vld [vmem:[%s2103_s14 + $0x54] sm:$0xf] }
  0x34   : > { %489 = vrot.lane.b32.xlu0 %v444_v29, %s1993_s27  ;;  %v1650_v44 = vcombine.low %v1568_v40, %v2107_v1  ;;  %v701_v45 = vsel %vm384_vm1, %v696_v33, %v700_v34  ;;  %v708_v46 = vor.u32 %v707_v37, %v703_v36  ;;  %v712_v47 = vrot.slane %v710_v39, 1  ;;  %v2222_v1 = vld [vmem:[%s2103_s14 + $0x4c] sm:$0xf]  ;;  %v2240_v9 = vld [vmem:[%s2103_s14 + $0x58] sm:$0xf] }
  0x35   : > { %v1646_v48 = vcombine.low %v1564_v43, %v2114_v4  ;;  %v653_v50 = vsel %vm384_vm1, %v648_v35, %v652_v5  ;;  %v660_v51 = vor.u32 %v659_v41, %v655_v17  ;;  %v664_v52 = vrot.slane %v662_v42, 1  ;;  %v2247_v14 = vld [vmem:[%s2103_s14 + $0x28] sm:$0xf]  ;;  %v2253_v21 = vld [vmem:[%s2103_s14 + $0x50] ss:$0 sps:$4 sm:$0x11]  }
  0x36   : > { %v1651_v56 = vcombine.low %v1569_v49, %v2167_v57  ;;  %v713_v4 = vsel %vm384_vm1, %v708_v46, %v712_v47  ;;  %v790_v58 = vrot.slane %v1650_v44, 1  ;;  %v791_v59 = vrot.slane %v2180_v13, 1  ;;  %v1576_v13 = vld [vmem:[%s2103_s14 + $0x24] sm:$0xf]  ;;  %v228_v37 = vld [vmem:[%s2103_s14 + $0x48] sm:$0xf] }
  0x37   : > { %612 = vrot.lane.b32.xlu1 %v1635_v12, %s1991_s23  ;;  %v1647_v61 = vcombine.low %v1565_v53, %v2173_v63  ;;  %v665_v62 = vsel %vm384_vm1, %v660_v51, %v664_v52  ;;  %v778_v0 = vrot.slane %v1646_v48, 1  ;;  %v779_v3 = vrot.slane %v2185_v20, 1  ;;  %v2260_v26 = vld [vmem:[%s2103_s14 + $0x20] ss:$0 sps:$4 sm:$0x11]  }
  0x38   : > { %604 = vrot.lane.b32.xlu0 %v1631_v19, %s1991_s23  ;;  %v1658_v57 = vcombine.low %v1582_v54, %v2222_v1  ;;  %v1654_v6 = vcombine.low %v1574_v55, %v2230_v60  ;;  %v792_v10 = vsel %vm521_vm0, %v790_v58, %v791_v59  ;;  %v793_v63 = vrot.slane %v1651_v56, 1  ;;  %v2266_v34 = vld [vmem:[%s2103_s14 + $0x5c] ss:$0 sps:$4 sm:$0x11]   ;;  %v2275_v39 = vld [vmem:[%s2103_s14 + $0x4c] sm:$0xf] }
  0x39   : > { %v794_v12 = vrot.slane %v2192_v24, 1  ;;  %v780_v15 = vsel %vm521_vm0, %v778_v0, %v779_v3  ;;  %v781_v16 = vrot.slane %v1647_v61, 1  ;;  %v782_v19 = vrot.slane %v2203_v11, 1  ;;  %v2271_v36 = vld [vmem:[%s2103_s14 + $0x2c] ss:$0 sps:$4 sm:$0x11]  }
  0x3a   : > { %v949_v20 = vshll.u32 %v1658_v57, 16  ;;  %v1659_v8 = vcombine.low %v1584_v7, %v2240_v9  ;;  %v901_v22 = vshll.u32 %v1654_v6, 16  ;;  %v1655_v24 = vcombine.low %v1576_v13, %v2247_v14  ;;  %v220_v40 = vld [vmem:[%s2103_s14 + $0x18] sm:$0xf]  ;;  %v2279_v17 = vld [vmem:[%s2103_s14 + $0x1c] sm:$0xf] }
  0x3b   : > { %746 = vrot.lane.b32.xlu1 %v701_v45, %s1994_s30  ;;  %v795_v25 = vsel %vm521_vm0, %v793_v63, %v794_v12  ;;  %v783_v27 = vsel %vm521_vm0, %v781_v16, %v782_v19  ;;  %v947_v29 = vshrl.u32 %v1658_v57, 16  ;;  %v954_v32 = vshll.u32 %v2253_v21, 16  ;;  %v1892_v41 = vld [vmem:[%s2731_s1] sm:$0xff]   ;;  %v1602_v42 = vld [vmem:[%s2103_s14 + $0x48] sm:$0xe] }
  0x3c   : > { %738 = vrot.lane.b32.xlu0 %v653_v50, %s1994_s30  ;;  %v961_v28 = vshll.u32 %v1659_v8, 16  ;;  %v951_v30 = vrot.slane %v949_v20, 1  ;;  %v913_v2 = vshll.u32 %v1655_v24, 16  ;;  %v899_v11 = vshrl.u32 %v1654_v6, 16  ;;  %v1598_v47 = vld [vmem:[%s2103_s14 + $0x18] sm:$0xe]  ;;  %1709 = vmatprep.subr.bf16.mxu0 %v1892_v41 }
  0x3d   : > { %v903_v33 = vrot.slane %v901_v22, 1  ;;  %v906_v35 = vshll.u32 %v2260_v26, 16  ;;  %v956_v43 = vrot.slane %v954_v32, 1  ;;  %v959_v44 = vshrl.u32 %v1659_v8, 16  ;;  %1731 = vmatprep.subr.bf16.mxu1 %v1892_v41  ;;  %1710 = vmatpush3.bf16.msra.mxu0 %v1892_v41  ;;  %v1893_v56 = vld [vmem:[%s2731_s1 + $0x8] sm:$0xff]  }
  0x3e   : > { %v952_v5 = vor.u32 %v951_v30, %v947_v29  ;;  %v963_v45 = vrot.slane %v961_v28, 1  ;;  %v966_v46 = vshll.u32 %v2266_v34, 16  ;;  %v911_v48 = vshrl.u32 %v1655_v24, 16  ;;  %1734 = vmatpush3.bf16.msra.mxu1 %v1892_v41  ;;  %v2303_v61 = vld [vmem:[%s2103_s14 + $0x50] ss:$0 sps:$4 sm:$0x11]   ;;  %1711 = vmatprep.subr.bf16.mxu0 %v1893_v56 }
  0x3f   : > { %748 = vrot.lane.b32.xlu1 %v713_v4, %s1994_s30  ;;  %v915_v49 = vrot.slane %v913_v2, 1  ;;  %v918_v50 = vshll.u32 %v2271_v36, 16  ;;  %v2291_v51 = vcombine.low %v228_v37, %v2275_v39  ;;  %v904_v52 = vor.u32 %v903_v33, %v899_v11  ;;  %v230_v7 = vld [vmem:[%s2103_s14 + $0x54] sm:$0xf]  ;;  %1732 = vmatprep.subr.bf16.mxu1 %v1893_v56  ;;  %v222_v13 = vld [vmem:[%s2103_s14 + $0x24] sm:$0xf] }
  0x40   : > { %740 = vrot.lane.b32.xlu0 %v665_v62, %s1994_s30  ;;  %v908_v53 = vrot.slane %v906_v35, 1  ;;  %v2294_v54 = vcombine.low %v220_v40, %v2279_v17  ;;  %v1674_v55 = vcombine.low %v1602_v42, %v2222_v1  ;;  %v1670_v4 = vcombine.low %v1598_v47, %v2230_v60  ;;  %v1603_v16 = vld [vmem:[%s2103_s14 + $0x54] sm:$0xe]  ;;  %v2345_v40 = vld [vmem:[%s2103_s14 + $0x5c] ss:$0 sps:$4 sm:$0x11]  }
  0x41   : > { %v964_v58 = vor.u32 %v963_v45, %v959_v44  ;;  %v968_v59 = vrot.slane %v966_v46, 1  ;;  %v957_v1 = vsel %vm384_vm1, %v952_v5, %v956_v43  ;;  %v916_v62 = vor.u32 %v915_v49, %v911_v48  ;;  %1712 = vmatpush3.bf16.msra.mxu0 %v1893_v56 }
  0x42   : > { %v920_v0 = vrot.slane %v918_v50, 1  ;;  %v460_v3 = vshll.u32 %v2291_v51, 16  ;;  %v909_v60 = vsel %vm384_vm1, %v904_v52, %v908_v53  ;;  %v1046_v63 = vrot.slane %v1674_v55, 1  ;;  %1735 = vmatpush3.bf16.msra.mxu1 %v1893_v56  ;;  %v246_v53 = vld [vmem:[%s2103_s14 + $0x48] sm:$0xe] }
  0x43   : > { %810 = vrot.lane.b32.xlu1 %v792_v10, %s1995_s5  ;;  %v2315_v10 = vld [vmem:[%s2103_s14 + $0x58] sm:$0xf]  ;;  %v1047_v12 = vrot.slane %v2253_v21, 1  ;;  %v969_v19 = vsel %vm384_vm1, %v964_v58, %v968_v59  ;;  %v1034_v20 = vrot.slane %v1670_v4, 1  ;;  %v465_v22 = vshll.u32 %v2303_v61, 16 }
  0x44   : > { %802 = vrot.lane.b32.xlu0 %v780_v15, %s1995_s5  ;;  %v2320_v15 = vld [vmem:[%s2103_s14 + $0x28] sm:$0xf]  ;;  %v921_v21 = vsel %vm384_vm1, %v916_v62, %v920_v0  ;;  %v2332_v28 = vcombine.low %v230_v7, %v2315_v10  ;;  %v410_v29 = vshrl.u32 %v2294_v54, 16  ;;  %v1675_v2 = vcombine.low %v1603_v16, %v2240_v9  ;;  %v2350_v9 = vld [vmem:[%s2103_s14 + $0x2c] ss:$0 sps:$4 sm:$0x11]  }
  0x45   : > { %v2337_v32 = vcombine.low %v222_v13, %v2320_v15  ;;  %v467_v33 = vrot.slane %v465_v22, 1  ;;  %v1048_v35 = vsel %vm521_vm0, %v1046_v63, %v1047_v12  ;;  %v1050_v45 = vrot.slane %v2266_v34, 1  ;;  %v247_v7 = vld [vmem:[%s2103_s14 + $0x54] sm:$0xe]  ;;  %v243_v63 = vld [vmem:[%s2103_s14 + $0x24] sm:$0xe] }
  0x46   : > { %v472_v5 = vshll.u32 %v2332_v28, 16  ;;  %v1049_v44 = vrot.slane %v1675_v2, 1  ;;  %v1038_v47 = vrot.slane %v2271_v36, 1  ;;  %v470_v49 = vshrl.u32 %v2332_v28, 16  ;;  %v242_v36 = vld [vmem:[%s2103_s14 + $0x18] sm:$0xe] }
  0x47   : > { %812 = vrot.lane.b32.xlu1 %v795_v25, %s1995_s5  ;;  %v458_v25 = vshrl.u32 %v2291_v51, 16  ;;  %v477_v52 = vshll.u32 %v2345_v40, 16  ;;  %v422_v56 = vshrl.u32 %v2337_v32, 16  ;;  %v429_v4 = vshll.u32 %v2350_v9, 16 }
  0x48   : > { %804 = vrot.lane.b32.xlu0 %v783_v27, %s1995_s5  ;;  %v462_v27 = vrot.slane %v460_v3, 1  ;;  %v474_v50 = vrot.slane %v472_v5, 1  ;;  %v1051_v58 = vsel %vm521_vm0, %v1049_v44, %v1050_v45  ;;  %v1628_v62 = vcombine.low %v246_v53, %v2275_v39  ;;  %v1894_v5 = vld [vmem:[%s2731_s1 + $0x10] ss:$0 sps:$4 sm:$0x33]  }
  0x49   : > { %v1624_v0 = vcombine.low %v242_v36, %v2279_v17  ;;  %v541_v12 = vrot.slane %v2303_v61, 1  ;;  %v1625_v61 = vcombine.low %v243_v63, %v2320_v15  ;;  %v2397_v15 = vld [vmem:[%s2103_s14 + $0x64] sm:$0xf]  ;;  %v2418_v44 = vld [vmem:[%s2103_s14 + $0x2c] ss:$0 sps:$4 sm:$0x11]   ;;  %1737 = vmatprep.subr.msk.bf16.mxu0 %vm1247_vm2, %v1894_v5  ;;  %1738 = vmatprep.subr.msk.bf16.mxu1 %vm1247_vm2, %v1894_v5 }
  0x4a   : > { %v463_v37 = vor.u32 %v462_v27, %v458_v25  ;;  %v475_v59 = vor.u32 %v474_v50, %v470_v49  ;;  %v540_v16 = vrot.slane %v1628_v62, 1  ;;  %v544_v27 = vrot.slane %v2345_v40, 1  ;;  %v2424_v53 = vld [vmem:[%s2103_s14 + $0x68] ss:$0 sps:$4 sm:$0x11]  }
  0x4b   : > { %866 = vrot.lane.b32.xlu1 %v1658_v57, %s1996_s9  ;;  %v2309_v57 = vld [vmem:[%s2103_s14 + $0x20] ss:$0 sps:$4 sm:$0x11]   ;;  %v528_v17 = vrot.slane %v1624_v0, 1  ;;  %v531_v2 = vrot.slane %v1625_v61, 1  ;;  %v734_v62 = vshll.u32 %v2424_v53, 16 }
  0x4c   : > { %858 = vrot.lane.b32.xlu0 %v1654_v6, %s1996_s9  ;;  %v412_v6 = vshll.u32 %v2294_v54, 16  ;;  %v468_v48 = vsel %vm384_vm1, %v463_v37, %v467_v33  ;;  %v529_v13 = vrot.slane %v2309_v57, 1  ;;  %v1546_v33 = vld [vmem:[%s2103_s14 + $0x30] sm:$0xf]  ;;  %v1570_v0 = vld [vmem:[%s2103_s14 + $0x54] sm:$0xe] }
  0x4d   : > { %v1566_v63 = vld [vmem:[%s2103_s14 + $0x24] sm:$0xe] }
  0x4e   : > { %v414_v30 = vrot.slane %v412_v6, 1  ;;  %v431_v6 = vrot.slane %v429_v4, 1 }
  0x4f   : > { %868 = vrot.lane.b32.xlu1 %v1659_v8, %s1996_s9  ;;  %v1035_v8 = vrot.slane %v2260_v26, 1  ;;  %v417_v26 = vshll.u32 %v2309_v57, 16  ;;  %v1544_v57 = vld [vmem:[%s2103_s14 + $0x24] sm:$0xf] }
  0x50   : > { %860 = vrot.lane.b32.xlu0 %v1655_v24, %s1996_s9  ;;  %v1599_v24 = vld [vmem:[%s2103_s14 + $0x24] sm:$0xe]  ;;  %v415_v42 = vor.u32 %v414_v30, %v410_v29  ;;  %v1554_v30 = vld [vmem:[%s2103_s14 + $0x60] sm:$0xf] }
  0x51   : > { %v1671_v11 = vcombine.low %v1599_v24, %v2247_v14  ;;  %v1036_v41 = vsel %vm521_vm0, %v1034_v20, %v1035_v8  ;;  %v419_v43 = vrot.slane %v417_v26, 1  ;;  %v424_v14 = vshll.u32 %v2337_v32, 16  ;;  %v1552_v20 = vld [vmem:[%s2103_s14 + $0x54] sm:$0xf]  ;;  %v2381_v8 = vld [vmem:[%s2103_s14 + $0x58] sm:$0xf] }
  0x52   : > { %v2387_v24 = vld [vmem:[%s2103_s14 + $0x28] sm:$0xf]  ;;  %v530_v26 = vsel %vm521_vm0, %v528_v17, %v529_v13  ;;  %v1637_v40 = vcombine.low %v1554_v30, %v2397_v15 }
  0x53   : > { %1002 = vrot.lane.b32.xlu1 %v957_v1, %s1997_s12  ;;  %v1037_v46 = vrot.slane %v1671_v11, 1  ;;  %v420_v55 = vsel %vm384_vm1, %v415_v42, %v419_v43  ;;  %v426_v34 = vrot.slane %v424_v14, 1  ;;  %v479_v1 = vrot.slane %v477_v52, 1  ;;  %v2413_v43 = vld [vmem:[%s2103_s14 + $0x5c] ss:$0 sps:$4 sm:$0x11]  }
  0x54   : > { %994 = vrot.lane.b32.xlu0 %v909_v60, %s1997_s12  ;;  %v1632_v29 = vcombine.low %v1544_v57, %v2387_v24  ;;  %v532_v11 = vrot.slane %v2350_v9, 1  ;;  %v729_v45 = vshll.u32 %v1637_v40, 16  ;;  %v722_v49 = vshll.u32 %v2413_v43, 16  ;;  %v1567_v57 = vld [vmem:[%s2103_s14 + $0x30] sm:$0xe] }
  0x55   : > { %v1039_v3 = vsel %vm521_vm0, %v1037_v46, %v1038_v47  ;;  %v427_v60 = vor.u32 %v426_v34, %v422_v56  ;;  %v480_v39 = vsel %vm384_vm1, %v475_v59, %v479_v1  ;;  %v674_v56 = vshll.u32 %v2418_v44, 16  ;;  %v2428_v34 = vld [vmem:[%s2103_s14 + $0x38] ss:$0 sps:$4 sm:$0x11]  }
  0x56   : > { %v669_v42 = vshll.u32 %v1632_v29, 16  ;;  %v533_v9 = vsel %vm521_vm0, %v531_v2, %v532_v11  ;;  %v667_v50 = vshrl.u32 %v1632_v29, 16  ;;  %v727_v36 = vshrl.u32 %v1637_v40, 16  ;;  %v1578_v2 = vld [vmem:[%s2103_s14 + $0x30] sm:$0xf] }
  0x57   : > { %1004 = vrot.lane.b32.xlu1 %v969_v19, %s1997_s12  ;;  %v1629_v19 = vcombine.low %v247_v7, %v2315_v10  ;;  %v432_v22 = vsel %vm384_vm1, %v427_v60, %v431_v6  ;;  %v542_v10 = vsel %vm521_vm0, %v540_v16, %v541_v12  ;;  %v731_v1 = vrot.slane %v729_v45, 1  ;;  %v2458_v11 = vld [vmem:[%s2103_s14 + $0x34] sm:$0xf]  ;;  %v2474_v45 = vld [vmem:[%s2103_s14 + $0x40] sm:$0xf] }
  0x58   : > { %996 = vrot.lane.b32.xlu0 %v921_v21, %s1997_s12  ;;  %v1636_v21 = vcombine.low %v1552_v20, %v2381_v8  ;;  %v671_v52 = vrot.slane %v669_v42, 1  ;;  %v686_v7 = vshll.u32 %v2428_v34, 16  ;;  %v1652_v12 = vcombine.low %v1570_v0, %v2381_v8  ;;  %v2468_v42 = vld [vmem:[%s2103_s14 + $0x70] sm:$0xf] }
  0x59   : > { %v543_v25 = vrot.slane %v1629_v19, 1  ;;  %v736_v16 = vrot.slane %v734_v62, 1  ;;  %v1648_v17 = vcombine.low %v1566_v63, %v2387_v24  ;;  %v1571_v19 = vld [vmem:[%s2103_s14 + $0x60] sm:$0xe] }
  0x5a   : > { %v717_v37 = vshll.u32 %v1636_v21, 16  ;;  %v715_v46 = vshrl.u32 %v1636_v21, 16  ;;  %v672_v59 = vor.u32 %v671_v52, %v667_v50  ;;  %v688_v61 = vrot.slane %v686_v7, 1  ;;  %v1586_v24 = vld [vmem:[%s2103_s14 + $0x60] sm:$0xf] }
  0x5b   : > { %1066 = vrot.lane.b32.xlu1 %v1048_v35, %s1998_s13  ;;  %v2403_v35 = vld [vmem:[%s2103_s14 + $0x34] sm:$0xf]  ;;  %v1653_v8 = vcombine.low %v1571_v19, %v2397_v15  ;;  %v785_v15 = vrot.slane %v2418_v44, 1  ;;  %v1580_v44 = vld [vmem:[%s2103_s14 + $0x3c] sm:$0xf] }
  0x5c   : > { %1058 = vrot.lane.b32.xlu0 %v1036_v41, %s1998_s13  ;;  %v545_v41 = vsel %vm521_vm0, %v543_v25, %v544_v27  ;;  %v1633_v14 = vcombine.low %v1546_v33, %v2403_v35  ;;  %v719_v47 = vrot.slane %v717_v37, 1  ;;  %v797_v25 = vrot.slane %v2413_v43, 1  ;;  %v2451_v27 = vld [vmem:[%s2103_s14 + $0x64] sm:$0xf] }
  0x5d   : > { %v1660_v33 = vcombine.low %v1586_v24, %v2451_v27  ;;  %v1888_v50 = vld [vmem:[%s2103_s14 + $0x68] ss:$0 sps:$4 sm:$0x11]  }
  0x5e   : > { %v720_v4 = vor.u32 %v719_v47, %v715_v46  ;;  %v679_v60 = vshrl.u32 %v1633_v14, 16 }
  0x5f   : > { %493 = vrot.lane.b32.xlu1 %v468_v48, %s1993_s27  ;;  %v1249_v48 = vsel %vm1247_vm2, %v1894_v5, 0  ;;  %v1656_v5 = vcombine.low %v1578_v2, %v2458_v11  ;;  %v973_v46 = vshll.u32 %v1660_v33, 16 }
  0x60   : > { %485 = vrot.lane.b32.xlu0 %v420_v55, %s1993_s27  ;;  %v681_v55 = vshll.u32 %v1633_v14, 16  ;;  %1714 = vmatpush3.bf16.msra.mxu0 %v1249_v48 }
  0x61   : > { %1736 = vmatpush3.bf16.msra.mxu1 %v1249_v48 }
  0x62   : > { %v683_v6 = vrot.slane %v681_v55, 1  ;;  %v1889_v55 = vld [vmem:[%s2103_s14 + $0x38] ss:$0 sps:$4 sm:$0x11]  }
  0x63   : > { %1068 = vrot.lane.b32.xlu1 %v1051_v58, %s1998_s13  ;;  %v724_v58 = vrot.slane %v722_v49, 1  ;;  %v925_v49 = vshll.u32 %v1656_v5, 16  ;;  %v930_v0 = vshll.u32 %v1889_v55, 16 }
  0x64   : > { %1060 = vrot.lane.b32.xlu0 %v1039_v3, %s1998_s13  ;;  %v676_v3 = vrot.slane %v674_v56, 1 }
  0x65   : > { %v725_v13 = vsel %vm384_vm1, %v720_v4, %v724_v58  ;;  %v975_v4 = vrot.slane %v973_v46, 1  ;;  %v923_v58 = vshrl.u32 %v1656_v5, 16 }
  0x66   : > { %v677_v20 = vsel %vm384_vm1, %v672_v59, %v676_v3  ;;  %v927_v59 = vrot.slane %v925_v49, 1  ;;  %v1891_v3 = vld [vmem:[%s2103_s14 + $0x44] ss:$0 sps:$4 sm:$0x11]  }
  0x67   : > { %495 = vrot.lane.b32.xlu1 %v480_v39, %s1993_s27  ;;  %v732_v39 = vor.u32 %v731_v1, %v727_v36  ;;  %v978_v36 = vshll.u32 %v1888_v50, 16  ;;  %v1890_v1 = vld [vmem:[%s2103_s14 + $0x74] ss:$0 sps:$4 sm:$0x11]  }
  0x68   : > { %487 = vrot.lane.b32.xlu0 %v432_v22, %s1993_s27  ;;  %v684_v22 = vor.u32 %v683_v6, %v679_v60  ;;  %v928_v63 = vor.u32 %v927_v59, %v923_v58 }
  0x69   : > { %v980_v7 = vrot.slane %v978_v36, 1 }
  0x6a   : > { %v689_v30 = vsel %vm384_vm1, %v684_v22, %v688_v61  ;;  %v1600_v22 = vld [vmem:[%s2103_s14 + $0x30] sm:$0xe] }
  0x6b   : > { %558 = vrot.lane.b32.xlu1 %v542_v10, %s1992_s24  ;;  %v796_v10 = vrot.slane %v1652_v12, 1 }
  0x6c   : > { %550 = vrot.lane.b32.xlu0 %v530_v26, %s1992_s24  ;;  %v784_v26 = vrot.slane %v1648_v17, 1 }
  0x6d   : > { %v798_v37 = vsel %vm521_vm0, %v796_v10, %v797_v25  ;;  %v1672_v10 = vcombine.low %v1600_v22, %v2458_v11  ;;  %v1605_v25 = vld [vmem:[%s2103_s14 + $0x6c] sm:$0xe] }
  0x6e   : > { %v786_v43 = vsel %vm521_vm0, %v784_v26, %v785_v15  ;;  %v1601_v15 = vld [vmem:[%s2103_s14 + $0x3c] sm:$0xe] }
  0x6f   : > { %560 = vrot.lane.b32.xlu1 %v545_v41, %s1992_s24  ;;  %v1588_v41 = vld [vmem:[%s2103_s14 + $0x6c] sm:$0xf]  ;;  %v1673_v11 = vcombine.low %v1601_v15, %v2474_v45 }
  0x70   : > { %552 = vrot.lane.b32.xlu0 %v533_v9, %s1992_s24  ;;  %v1661_v47 = vcombine.low %v1588_v41, %v2468_v42  ;;  %v1041_v41 = vrot.slane %v1889_v55, 1 }
  0x72   : > { %v985_v56 = vshll.u32 %v1661_v47, 16  ;;  %v983_v6 = vshrl.u32 %v1661_v47, 16 }
  0x73   : > { %614 = vrot.lane.b32.xlu1 %v1636_v21, %s1991_s23  ;;  %v737_v21 = vsel %vm384_vm1, %v732_v39, %v736_v16  ;;  %v1604_v39 = vld [vmem:[%s2103_s14 + $0x60] sm:$0xe]  ;;  %v932_v16 = vrot.slane %v930_v0, 1  ;;  %s202_s14 = sand.u32 1, %s1965_s16  }
  0x74   : > { %606 = vrot.lane.b32.xlu0 %v1632_v29, %s1991_s23  ;;  %v1649_v29 = vcombine.low %v1567_v57, %v2403_v35  ;;  %v800_v35 = vrot.slane %v2424_v53, 1  ;;  %v1657_v53 = vcombine.low %v1580_v44, %v2474_v45  ;;  %v987_v12 = vrot.slane %v985_v56, 1 }
  0x75   : > { %v1676_v61 = vcombine.low %v1604_v39, %v2451_v27  ;;  %v933_v24 = vsel %vm384_vm1, %v928_v63, %v932_v16  ;;  %v1677_v27 = vcombine.low %v1605_v25, %v2468_v42 }
  0x76   : > { %v787_v9 = vrot.slane %v1649_v29, 1  ;;  %v937_v62 = vshll.u32 %v1657_v53, 16  ;;  %v935_v17 = vshrl.u32 %v1657_v53, 16 }
  0x77   : > { %616 = vrot.lane.b32.xlu1 %v1637_v40, %s1991_s23  ;;  %v799_v40 = vrot.slane %v1653_v8, 1  ;;  %v988_v8 = vor.u32 %v987_v12, %v983_v6  ;;  %v1055_v42 = vrot.slane %v1677_v27, 1 }
  0x78   : > { %608 = vrot.lane.b32.xlu0 %v1633_v14, %s1991_s23  ;;  %v788_v14 = vrot.slane %v2428_v34, 1  ;;  %v971_v34 = vshrl.u32 %v1660_v33, 16  ;;  %v939_v19 = vrot.slane %v937_v62, 1 }
  0x79   : > { %v801_v48 = vsel %vm521_vm0, %v799_v40, %v800_v35  ;;  %v1053_v40 = vrot.slane %v1888_v50, 1 }
  0x7a   : > { %v789_v52 = vsel %vm521_vm0, %v787_v9, %v788_v14  ;;  %v976_v60 = vor.u32 %v975_v4, %v971_v34  ;;  %v1056_v14 = vrot.slane %v1890_v1, 1 }
  0x7b   : > { %750 = vrot.lane.b32.xlu1 %v725_v13, %s1994_s30  ;;  %v990_v13 = vshll.u32 %v1890_v1, 16 }
  0x7c   : > { %742 = vrot.lane.b32.xlu0 %v677_v20, %s1994_s30  ;;  %v942_v20 = vshll.u32 %v1891_v3, 16  ;;  %v981_v57 = vsel %vm384_vm1, %v976_v60, %v980_v7  ;;  %v1057_v49 = vsel %vm521_vm0, %v1055_v42, %v1056_v14 }
  0x7e   : > { %v944_v26 = vrot.slane %v942_v20, 1 }
  0x7f   : > { %752 = vrot.lane.b32.xlu1 %v737_v21, %s1994_s30  ;;  %v992_v21 = vrot.slane %v990_v13, 1 }
  0x80   : > { %744 = vrot.lane.b32.xlu0 %v689_v30, %s1994_s30  ;;  %v940_v30 = vor.u32 %v939_v19, %v935_v17  ;;  %s2677_s30 = scalar_lea.sflag [#allocation3], %s202_s14 }
  0x82   : > { %v945_v35 = vsel %vm384_vm1, %v940_v30, %v944_v26 }
  0x83   : > { %814 = vrot.lane.b32.xlu1 %v798_v37, %s1995_s5  ;;  %v1052_v37 = vrot.slane %v1676_v61, 1 }
  0x84   : > { %806 = vrot.lane.b32.xlu0 %v786_v43, %s1995_s5 }
  0x85   : > { %v1054_v9 = vsel %vm521_vm0, %v1052_v37, %v1053_v40 }
  0x87   : > { %816 = vrot.lane.b32.xlu1 %v801_v48, %s1995_s5  ;;  %v1044_v48 = vrot.slane %v1891_v3, 1 }
  0x88   : > { %808 = vrot.lane.b32.xlu0 %v789_v52, %s1995_s5 }
  0x8b   : > { %870 = vrot.lane.b32.xlu1 %v1660_v33, %s1996_s9  ;;  %v993_v33 = vsel %vm384_vm1, %v988_v8, %v992_v21 }
  0x8c   : > { %862 = vrot.lane.b32.xlu0 %v1656_v5, %s1996_s9  ;;  %v1040_v5 = vrot.slane %v1672_v10, 1 }
  0x8e   : > { %v1042_v46 = vsel %vm521_vm0, %v1040_v5, %v1041_v41 }
  0x8f   : > { %872 = vrot.lane.b32.xlu1 %v1661_v47, %s1996_s9  ;;  %v1043_v47 = vrot.slane %v1673_v11, 1 }
  0x90   : > { %864 = vrot.lane.b32.xlu0 %v1657_v53, %s1996_s9  ;;  %s1533_s9 = sshll.u32 %s202_s14, 7 }
  0x91   : > { %v1045_v50 = vsel %vm521_vm0, %v1043_v47, %v1044_v48  ;;  %s2627_s10 = scalar_lea.vmem [#allocation2], %s1533_s9  ;;  %s1899_s9 = sshll.u32 %s1999_s8, 4  ;;  %s1900_s9 = int_to_ptr.vmem [resolvable:$false] %s1899_s9 }
  0x93   : > { %v2499_v29 = vpop.permute.xlu1 %610  ;;  %1006 = vrot.lane.b32.xlu1 %v981_v57, %s1997_s12 }
  0x94   : > { %v603_v2 = vpop.permute.xlu0 %602  ;;  %998 = vrot.lane.b32.xlu0 %v933_v24, %s1997_s12 }
  0x97   : > { %1008 = vrot.lane.b32.xlu1 %v993_v33, %s1997_s12 }
  0x98   : > { %v555_v43 = vpop.permute.xlu1 %554  ;;  %1000 = vrot.lane.b32.xlu0 %v945_v35, %s1997_s12  ;;  %s1693_s12 = sshll.u32 %s1977_s19, 5  ;;  %s1442_s19 = sshll.u32 %s2627_s10, 4  ;;  %s2670_s19 = int_to_ptr.vmem [resolvable:$true] %s1442_s19 }
  0x99   : > { %v547_v44 = vpop.permute.xlu0 %546  ;;  %s1895_s5 = scalar_lea.vmem %s2670_s19, 2048  ;;  %p1902_p2 = scmp.lt.s32.totalorder %s2670_s19, %s1900_s9 }
  0x9a   : > { %p1896_p13 = scmp.ne.s32.totalorder %s2670_s19, %s1895_s5 }
  0x9b   : > { %1070 = vrot.lane.b32.xlu1 %v1054_v9, %s1998_s13 }
  0x9c   : > { %v557_v45 = vpop.permute.xlu1 %556  ;;  %1062 = vrot.lane.b32.xlu0 %v1042_v46, %s1998_s13  ;;  %p1897_p0 = pnand %p1896_p13, %p2077_p3 }
  0x9e   : > { %v549_v52 = vpop.permute.xlu0 %548  ;;  %p1898_p1 = pneg %p1897_p0 }
  0x9f   : > { %1072 = vrot.lane.b32.xlu1 %v1057_v49, %s1998_s13 }
  0xa0   : > { %1064 = vrot.lane.b32.xlu0 %v1045_v50, %s1998_s13  ;;  %s2643_s13 = sadd.s32 %s1693_s12, %s1692_s11  ;;  %s1901_s11 = scalar_lea.vmem %s1900_s9, 4096 }
  0xa1   : > { %v484_v53 = vpop.permute.xlu1 %483  ;;  %s1694_s18 = sshll.u32 %s2643_s13, 7  ;;  %p1903_p4 = scmp.lt.s32.totalorder %s1901_s11, %s1895_s5 }
  0xa2   : > { %v482_v55 = vpop.permute.xlu0 %481  ;;  %s2666_s23 = scalar_lea.hbm %s2734_s4, %s1694_s18 }
  0xa3   : > { %v1076_v16 = vsel %vm1074_vm3, %v2140_v23, %v482_v55  ;;  %p1904_p5 = por %p1903_p4, %p1902_p2 }
  0xa4   : > { %v1093_v22 = vsel %vm1091_vm4, %v1076_v16, %v547_v44 }
  0xa5   : > { %v492_v56 = vpop.permute.xlu1 %491  ;;  %v1110_v8 = vsel %vm1108_vm5, %v1093_v22, %v603_v2  ;;  %v1078_v2 = vsel %vm1074_vm3, %v2153_v38, %v484_v53  ;;  %p1905_p6 = pnand %p1904_p5, %p1898_p1 }
  0xa6   : > { %v490_v34 = vpop.permute.xlu0 %489  ;;  %v1095_v35 = vsel %vm1091_vm4, %v1078_v2, %v549_v52 }
  0xa7   : > { %v1084_v39 = vsel %vm1074_vm3, %v2135_v18, %v490_v34 }
  0xa8   : > { %v1101_v19 = vsel %vm1091_vm4, %v1084_v39, %v555_v43 }
  0xa9   : > { %v613_v4 = vpop.permute.xlu1 %612  ;;  %v1118_v61 = vsel %vm1108_vm5, %v1101_v19, %v2499_v29  ;;  %v1086_v29 = vsel %vm1074_vm3, %v2147_v31, %v492_v56 }
  0xaa   : > { %v605_v36 = vpop.permute.xlu0 %604  ;;  %v1103_v11 = vsel %vm1091_vm4, %v1086_v29, %v557_v45 }
  0xab   : > { %v1120_v31 = vsel %vm1108_vm5, %v1103_v11, %v613_v4  ;;  %v1112_v38 = vsel %vm1108_vm5, %v1095_v35, %v605_v36 }
  0xad   : > { %v747_v58 = vpop.permute.xlu1 %746 }
  0xae   : > { %v739_v59 = vpop.permute.xlu0 %738  ;;  %v1135_v18 = vsel %vm1125_vm6, %v1118_v61, %v747_v58 }
  0xaf   : > { %v1127_v21 = vsel %vm1125_vm6, %v1110_v8, %v739_v59 }
  0xb1   : > { %v749_v1 = vpop.permute.xlu1 %748 }
  0xb2   : > { %v741_v62 = vpop.permute.xlu0 %740  ;;  %v1137_v41 = vsel %vm1125_vm6, %v1120_v31, %v749_v1 }
  0xb3   : > { %v1129_v9 = vsel %vm1125_vm6, %v1112_v38, %v741_v62 }
  0xb5   : > { %v811_v0 = vpop.permute.xlu1 %810 }
  0xb6   : > { %v803_v3 = vpop.permute.xlu0 %802  ;;  %v1152_v10 = vsel %vm1142_vm7, %v1135_v18, %v811_v0 }
  0xb7   : > { %v1144_v25 = vsel %vm1142_vm7, %v1127_v21, %v803_v3 }
  0xb9   : > { %v813_v60 = vpop.permute.xlu1 %812 }
  0xba   : > { %v805_v6 = vpop.permute.xlu0 %804  ;;  %v1154_v42 = vsel %vm1142_vm7, %v1137_v41, %v813_v60 }
  0xbb   : > { %v1146_v14 = vsel %vm1142_vm7, %v1129_v9, %v805_v6 }
  0xbd   : > { %v867_v7 = vpop.permute.xlu1 %866 }
  0xbe   : > { %v859_v63 = vpop.permute.xlu0 %858  ;;  %v1169_v24 = vsel %vm1159_vm8, %v1152_v10, %v867_v7 }
  0xbf   : > { %v1161_v30 = vsel %vm1159_vm8, %v1144_v25, %v859_v63 }
  0xc1   : > { %v869_v12 = vpop.permute.xlu1 %868 }
  0xc2   : > { %v861_v13 = vpop.permute.xlu0 %860  ;;  %v1171_v44 = vsel %vm1159_vm8, %v1154_v42, %v869_v12 }
  0xc3   : > { %v1163_v46 = vsel %vm1159_vm8, %v1146_v14, %v861_v13 }
  0xc5   : > { %v1003_v17 = vpop.permute.xlu1 %1002 }
  0xc6   : > { %v995_v20 = vpop.permute.xlu0 %994  ;;  %v1186_v26 = vsel %vm1176_vm9, %v1169_v24, %v1003_v17 }
  0xc7   : > { %v1178_v27 = vsel %vm1176_vm9, %v1161_v30, %v995_v20 }
  0xc9   : > { %v1005_v57 = vpop.permute.xlu1 %1004 }
  0xca   : > { %v997_v23 = vpop.permute.xlu0 %996  ;;  %v1188_v47 = vsel %vm1176_vm9, %v1171_v44, %v1005_v57 }
  0xcb   : > { %v1180_v45 = vsel %vm1176_vm9, %v1163_v46, %v997_v23 }
  0xcd   : > { %v1067_v15 = vpop.permute.xlu1 %1066 }
  0xce   : > { %v1059_v33 = vpop.permute.xlu0 %1058  ;;  %v1203_v37 = vsel %vm1193_vm10, %v1186_v26, %v1067_v15 }
  0xcf   : > { %v1195_v40 = vsel %vm1193_vm10, %v1178_v27, %v1059_v33  ;;  %1723 = vmatprep.mubr.msk.bf16.mxu1 %vm1230_vm11, %v1203_v37 }
  0xd0   : > { %1715 = vmatprep.mubr.msk.bf16.mxu0 %vm1230_vm11, %v1195_v40 }
  0xd1   : > { %v494_v5 = vpop.permute.xlu1 %493 }
  0xd2   : > { %v486_v43 = vpop.permute.xlu0 %485  ;;  %v1088_v56 = vsel %vm1074_vm3, %v2291_v51, %v494_v5 }
  0xd3   : > { %v1080_v4 = vsel %vm1074_vm3, %v2294_v54, %v486_v43 }
  0xd5   : > { %v1069_v48 = vpop.permute.xlu1 %1068 }
  0xd6   : > { %v1205_v49 = vsel %vm1193_vm10, %v1188_v47, %v1069_v48  ;;  %v1061_v50 = vpop.permute.xlu0 %1060 }
  0xd7   : > { %v1197_v52 = vsel %vm1193_vm10, %v1180_v45, %v1061_v50  ;;  %1724 = vmatmul.mubr.msk.bf16.vlgmr.msra.gmra.mrb[0].mxu1 %vm1230_vm11, %v1205_v49  ;;  %v2603_v50 = vld [vmem:[%s2732_s2] ss:$0 sm:$0xff] }
  0xd8   : > { %1716 = vmatmul.mubr.msk.bf16.vlgmr.msra.gmra.mrb[0].mxu0 %vm1230_vm11, %v1197_v52  ;;  %v2608_v52 = vld [vmem:[%s2733_s3] ss:$0 sm:$0xff] }
  0xd9   : > { %v496_v53 = vpop.permute.xlu1 %495 }
  0xda   : > { %v488_v55 = vpop.permute.xlu0 %487  ;;  %v1090_v1 = vsel %vm1074_vm3, %v2332_v28, %v496_v53 }
  0xdb   : > { %v1082_v0 = vsel %vm1074_vm3, %v2337_v32, %v488_v55 }
  0xdd   : > { %v559_v34 = vpop.permute.xlu1 %558 }
  0xde   : > { %v1105_v36 = vsel %vm1091_vm4, %v1088_v56, %v559_v34  ;;  %v551_v58 = vpop.permute.xlu0 %550 }
  0xdf   : > { %v1097_v59 = vsel %vm1091_vm4, %v1080_v4, %v551_v58 }
  0xe1   : > { %v561_v62 = vpop.permute.xlu1 %560 }
  0xe2   : > { %v1107_v3 = vsel %vm1091_vm4, %v1090_v1, %v561_v62  ;;  %v553_v60 = vpop.permute.xlu0 %552 }
  0xe3   : > { %v1099_v51 = vsel %vm1091_vm4, %v1082_v0, %v553_v60 }
  0xe5   : > { %v615_v6 = vpop.permute.xlu1 %614 }
  0xe6   : > { %v607_v7 = vpop.permute.xlu0 %606  ;;  %v1122_v23 = vsel %vm1108_vm5, %v1105_v36, %v615_v6 }
  0xe7   : > { %v1114_v10 = vsel %vm1108_vm5, %v1097_v59, %v607_v7 }
  0xe9   : > { %v617_v54 = vpop.permute.xlu1 %616 }
  0xea   : > { %v609_v63 = vpop.permute.xlu0 %608  ;;  %v1124_v2 = vsel %vm1108_vm5, %v1107_v3, %v617_v54 }
  0xeb   : > { %v1116_v40 = vsel %vm1108_vm5, %v1099_v51, %v609_v63 }
  0xed   : > { %v751_v12 = vpop.permute.xlu1 %750 }
  0xee   : > { %v743_v13 = vpop.permute.xlu0 %742  ;;  %v1139_v25 = vsel %vm1125_vm6, %v1122_v23, %v751_v12 }
  0xef   : > { %v1131_v29 = vsel %vm1125_vm6, %v1114_v10, %v743_v13 }
  0xf1   : > { %v753_v39 = vpop.permute.xlu1 %752 }
  0xf2   : > { %v745_v16 = vpop.permute.xlu0 %744  ;;  %v1141_v11 = vsel %vm1125_vm6, %v1124_v2, %v753_v39 }
  0xf3   : > { %v1133_v38 = vsel %vm1125_vm6, %v1116_v40, %v745_v16 }
  0xf5   : > { %v815_v17 = vpop.permute.xlu1 %814 }
  0xf6   : > { %v807_v19 = vpop.permute.xlu0 %806  ;;  %v1156_v30 = vsel %vm1142_vm7, %v1139_v25, %v815_v17 }
  0xf7   : > { %v1148_v26 = vsel %vm1142_vm7, %v1131_v29, %v807_v19 }
  0xf9   : > { %v817_v28 = vpop.permute.xlu1 %816 }
  0xfa   : > { %v809_v20 = vpop.permute.xlu0 %808  ;;  %v1158_v41 = vsel %vm1142_vm7, %v1141_v11, %v817_v28 }
  0xfb   : > { %v1150_v9 = vsel %vm1142_vm7, %v1133_v38, %v809_v20 }
  0xfd   : > { %v871_v22 = vpop.permute.xlu1 %870 }
  0xfe   : > { %v863_v61 = vpop.permute.xlu0 %862  ;;  %v1173_v15 = vsel %vm1159_vm8, %v1156_v30, %v871_v22 }
  0xff   : > { %v1165_v27 = vsel %vm1159_vm8, %v1148_v26, %v863_v61 }
 0x101   : > { %v873_v32 = vpop.permute.xlu1 %872 }
 0x102   : > { %v865_v57 = vpop.permute.xlu0 %864  ;;  %v1175_v42 = vsel %vm1159_vm8, %v1158_v41, %v873_v32 }
 0x103   : > { %v1167_v14 = vsel %vm1159_vm8, %v1150_v9, %v865_v57 }
 0x105   : > { %v1007_v18 = vpop.permute.xlu1 %1006 }
 0x106   : > { %v999_v8 = vpop.permute.xlu0 %998  ;;  %v1190_v33 = vsel %vm1176_vm9, %v1173_v15, %v1007_v18 }
 0x107   : > { %v1182_v31 = vsel %vm1176_vm9, %v1165_v27, %v999_v8 }
 0x109   : > { %v1009_v21 = vpop.permute.xlu1 %1008 }
 0x10a   : > { %v1001_v24 = vpop.permute.xlu0 %1000  ;;  %v1192_v44 = vsel %vm1176_vm9, %v1175_v42, %v1009_v21 }
 0x10b   : > { %v1184_v47 = vsel %vm1176_vm9, %v1167_v14, %v1001_v24 }
 0x10d   : > { %v1071_v37 = vpop.permute.xlu1 %1070 }
 0x10e   : > { %v1207_v35 = vsel %vm1193_vm10, %v1190_v33, %v1071_v37  ;;  %v1063_v5 = vpop.permute.xlu0 %1062 }
 0x10f   : > { %v1199_v43 = vsel %vm1193_vm10, %v1182_v31, %v1063_v5  ;;  %1727 = vmatprep.mubr.msk.bf16.mxu1 %vm1230_vm11, %v1207_v35 }
 0x110   : > { %1719 = vmatprep.mubr.msk.bf16.mxu0 %vm1230_vm11, %v1199_v43 }
 0x111   : > { %v1073_v46 = vpop.permute.xlu1 %1072 }
 0x112   : > { %v1209_v48 = vsel %vm1193_vm10, %v1192_v44, %v1073_v46  ;;  %v1065_v45 = vpop.permute.xlu0 %1064 }
 0x113   : > { %v1201_v49 = vsel %vm1193_vm10, %v1184_v47, %v1065_v45  ;;  %1728 = vmatmul.mubr.msk.bf16.gmra.mrb[4].mxu1 %vm1230_vm11, %v1209_v48 }
 0x114   : > { %1720 = vmatmul.mubr.msk.bf16.gmra.mrb[4].mxu0 %vm1230_vm11, %v1201_v49 }
 0x1aa   : > { %v1725_v53 = vpop.f32.mrb[0].mxu1 }
 0x1ab   : > { %v1717_v55 = vpop.f32.mrb[0].mxu0  ;;  %v1365_v56 = vmul.f32 %v1725_v53, %v2603_v50  ;;  %v1317_v34 = vpop.f32.mrb[1].mxu1 }
 0x1ac   : > { %v1357_v4 = vmul.f32 %v1717_v55, %v2603_v50  ;;  %v1285_v36 = vpop.f32.mrb[1].mxu0  ;;  %v1363_v58 = vmul.f32 %v2603_v50, %v1317_v34  ;;  %v1726_v59 = vpop.f32.mrb[2].mxu1 }
 0x1ad   : > { %v1388_v1 = vadd.f32 %v2608_v52, %v1365_v56  ;;  %v1355_v62 = vmul.f32 %v2603_v50, %v1285_v36  ;;  %v1718_v0 = vpop.f32.mrb[2].mxu0  ;;  %v1366_v3 = vmul.f32 %v1726_v59, %v2603_v50  ;;  %v1320_v60 = vpop.f32.mrb[3].mxu1 }
 0x1ae   : > { %v1380_v51 = vadd.f32 %v2608_v52, %v1357_v4  ;;  %v1386_v6 = vadd.f32 %v2608_v52, %v1363_v58  ;;  %v1358_v7 = vmul.f32 %v1718_v0, %v2603_v50  ;;  %v1288_v54 = vpop.f32.mrb[3].mxu0  ;;  %v1364_v63 = vmul.f32 %v2603_v50, %v1320_v60 }
 0x1af   : > { %v1404_v12 = vmax.f32 %v1388_v1, 0.0  ;;  %v1378_v13 = vadd.f32 %v2608_v52, %v1355_v62  ;;  %v1389_v39 = vadd.f32 %v2608_v52, %v1366_v3  ;;  %v1356_v16 = vmul.f32 %v2603_v50, %v1288_v54 }
 0x1b0   : > { %v1396_v17 = vmax.f32 %v1380_v51, 0.0  ;;  %v1402_v19 = vmax.f32 %v1386_v6, 0.0  ;;  %v1381_v28 = vadd.f32 %v2608_v52, %v1358_v7  ;;  %v1387_v20 = vadd.f32 %v2608_v52, %v1364_v63 }
 0x1b1   : > { %1420 = vst [vmem:[%s2627_s10 + $0x50] sm:$0xff] %v1404_v12  ;;  %v1394_v22 = vmax.f32 %v1378_v13, 0.0  ;;  %v1405_v61 = vmax.f32 %v1389_v39, 0.0  ;;  %v1379_v32 = vadd.f32 %v2608_v52, %v1356_v16 }
 0x1b2   : > { %1412 = vst [vmem:[%s2627_s10 + $0x10] sm:$0xff] %v1396_v17  ;;  %1418 = vst [vmem:[%s2627_s10 + $0x40] sm:$0xff] %v1402_v19  ;;  %v1397_v57 = vmax.f32 %v1381_v28, 0.0  ;;  %v1403_v18 = vmax.f32 %v1387_v20, 0.0 }
 0x1b3   : > { %1410 = vst [vmem:[%s2627_s10] sm:$0xff] %v1394_v22  ;;  %1421 = vst [vmem:[%s2627_s10 + $0x58] sm:$0xff] %v1405_v61  ;;  %v1395_v8 = vmax.f32 %v1379_v32, 0.0 }
 0x1b4   : > { %1413 = vst [vmem:[%s2627_s10 + $0x18] sm:$0xff] %v1397_v57  ;;  %1419 = vst [vmem:[%s2627_s10 + $0x48] sm:$0xff] %v1403_v18 }
 0x1b5   : > { %1411 = vst [vmem:[%s2627_s10 + $0x8] sm:$0xff] %v1395_v8 }
 0x1e6   : > { %v1729_v23 = vpop.f32.mrb[4].mxu1 }
 0x1e7   : > { %v1721_v21 = vpop.f32.mrb[4].mxu0  ;;  %v1369_v10 = vmul.f32 %v1729_v23, %v2603_v50  ;;  %v1333_v25 = vpop.f32.mrb[5].mxu1 }
 0x1e8   : > { %v1361_v24 = vmul.f32 %v1721_v21, %v2603_v50  ;;  %v1301_v29 = vpop.f32.mrb[5].mxu0  ;;  %v1367_v30 = vmul.f32 %v2603_v50, %v1333_v25  ;;  %v1730_v26 = vpop.f32.mrb[6].mxu1 }
 0x1e9   : > { %v1392_v15 = vadd.f32 %v2608_v52, %v1369_v10  ;;  %v1359_v2 = vmul.f32 %v2603_v50, %v1301_v29  ;;  %v1722_v27 = vpop.f32.mrb[6].mxu0  ;;  %v1370_v33 = vmul.f32 %v1730_v26, %v2603_v50  ;;  %v1336_v37 = vpop.f32.mrb[7].mxu1 }
 0x1ea   : > { %v1384_v40 = vadd.f32 %v2608_v52, %v1361_v24  ;;  %v1390_v11 = vadd.f32 %v2608_v52, %v1367_v30  ;;  %v1362_v31 = vmul.f32 %v1722_v27, %v2603_v50  ;;  %v1304_v35 = vpop.f32.mrb[7].mxu0  ;;  %v1368_v5 = vmul.f32 %v2603_v50, %v1336_v37 }
 0x1eb   : > { %v1408_v38 = vmax.f32 %v1392_v15, 0.0  ;;  %v1382_v41 = vadd.f32 %v2608_v52, %v1359_v2  ;;  %v1393_v43 = vadd.f32 %v2608_v52, %v1370_v33  ;;  %v1360_v9 = vmul.f32 %v2603_v50, %v1304_v35 }
 0x1ec   : > { %v1400_v42 = vmax.f32 %v1384_v40, 0.0  ;;  %v1406_v14 = vmax.f32 %v1390_v11, 0.0  ;;  %v1385_v44 = vadd.f32 %v2608_v52, %v1362_v31  ;;  %v1391_v46 = vadd.f32 %v2608_v52, %v1368_v5 }
 0x1ed   : > { %1424 = vst [vmem:[%s2627_s10 + $0x70] sm:$0xff] %v1408_v38  ;;  %v1398_v47 = vmax.f32 %v1382_v41, 0.0  ;;  %v1409_v48 = vmax.f32 %v1393_v43, 0.0  ;;  %v1383_v45 = vadd.f32 %v2608_v52, %v1360_v9 }
 0x1ee   : > { %1416 = vst [vmem:[%s2627_s10 + $0x30] sm:$0xff] %v1400_v42  ;;  %1422 = vst [vmem:[%s2627_s10 + $0x60] sm:$0xff] %v1406_v14  ;;  %v1401_v49 = vmax.f32 %v1385_v44, 0.0  ;;  %v1407_v50 = vmax.f32 %v1391_v46, 0.0 }
 0x1ef   : > { %1414 = vst [vmem:[%s2627_s10 + $0x20] sm:$0xff] %v1398_v47  ;;  %1425 = vst [vmem:[%s2627_s10 + $0x78] sm:$0xff] %v1409_v48  ;;  %v1399_v53 = vmax.f32 %v1383_v45, 0.0 }
 0x1f0   : > { %1417 = vst [vmem:[%s2627_s10 + $0x38] sm:$0xff] %v1401_v49  ;;  %1423 = vst [vmem:[%s2627_s10 + $0x68] sm:$0xff] %v1407_v50 }
 0x1f1   : > { %1415 = vst [vmem:[%s2627_s10 + $0x28] sm:$0xff] %v1399_v53 }
 0x1f2   : > { %1908 = shalt.err (!%p1905_p6)
}
 0x1f3   : > { %s1909_s14 = scalar_lea.hbm %s2666_s23, 2048  ;;  %s1913_s13 = scalar_lea.hbm %s2734_s4, 8192 }
 0x1f4   : > { %p1910_p7 = scmp.ne.s32.totalorder %s2666_s23, %s1909_s14  ;;  %p1914_p11 = scmp.lt.u32.totalorder %s2666_s23, %s2734_s4 }
 0x1f5   : > { %p1915_p12 = scmp.lt.u32.totalorder %s1913_s13, %s1909_s14  ;;  %p1917_p0 = scmp.lt.u32.totalorder %s1909_s14, %s2666_s23 }
 0x1f6   : > { %p1911_p9 = pnand %p1910_p7, %p2077_p3 }
 0x1f7   : > { %p1916_p13 = por %p1915_p12, %p1914_p11 }
 0x1f8   : > { %p1912_p10 = pneg %p1911_p9 }
 0x1f9   : > { %p1918_p1 = por %p1917_p0, %p1916_p13 }
 0x1fb   : > { %p1919_p2 = pnand %p1918_p1, %p1912_p10 }
 0x1fd   : > { %1922 = shalt.err (!%p1919_p2)
}
 0x1fe   : > { %s2000_s6 = smov 128  }
 0x1ff   : > { %1740 = dma.vmem_to_hbm [thread:$0]  (%p2077_p3), %s2670_s19, 2048, %s2666_s23, %s2677_s30, %s2000_s6, %s2000_s6, %s1992_s24  }
 0x200 PF: > { %p1746_p4 = scmp.ge.s32.totalorder %s1989_s22, 2  ;;  %s1457_s5 = sand.u32 1, %s1961_s15  }
 0x201   : > { %s1458_s8 = scalar_lea.sflag [#allocation3], %s1457_s5 }
 0x202   : > { %p1743_p5 = pnand %p1746_p4, %p2086_p8 }
 0x204   : > { %1956 = dma.done.wait (!%p1743_p5), %s1458_s8, 2048  }
 0x205   : > { %1958 = vsyncadd (!%p1743_p5), %s1458_s8, 4294965248  ;;  %s17_s22 = sadd.s32 1, %s1989_s22   ;;  %s2737_s15 = smov %s1965_s16 }
 0x206   : > { %p14_p6 = scmp.ge.s32.totalorder %s17_s22, 6   ;;  %s2738_s16 = smov %s1969_s17 }
 0x207   : > { %s2739_s17 = smov %s2095_s7  ;;  %s2740_s18 = smov %s1981_s20 }
 0x208   : > { %s2741_s19 = smov %s1985_s21  ;;  %s2742_s20 = smov %s2745_s25 }
 0x209   : > { %s2743_s21 = smov %s2749_s26  ;;  %16 = sbr.rel (!%p14_p6) target bundleno = 5 (0x5), region = 74 }
 0x210   :  { %1463 = vsyncpa [#allocation3], 1 }
 0x211   :  { %1465 = vsyncpa [#allocation3 + $0x1], 1 }

</bundles_post_ra>
